<compile_context>
chip_gen: v7x
topology: tpu7x:2x2x1
jax: 0.10.0
libtpu: 0.0.40
codegen_flags: <defaults>
</compile_context>

<pallas_src>
import functools

import jax
import jax.numpy as jnp
import numpy as np
from jax import lax
from jax.experimental import pallas as pl
from jax.experimental.pallas import tpu as pltpu


# ----------------------------------------------------------------------------
# Host-built bilinear interpolation matrices (align_corners=True) + padding.
# These run at LOW resolution only (after commuting with the 1x1 conv).
# ----------------------------------------------------------------------------
def _bilinear_matrix_np(l_in: int, l_out: int) -> np.ndarray:
    """Interpolation matrix M (l_out, l_in): out = M @ in, align_corners=True."""
    if l_in == 1:
        return np.ones((l_out, 1), dtype=np.float32)
    if l_out == 1:
        m = np.zeros((1, l_in), dtype=np.float32)
        m[0, 0] = 1.0
        return m
    j = np.arange(l_out, dtype=np.float64)
    src = j * (l_in - 1) / (l_out - 1)
    lo = np.clip(np.floor(src).astype(np.int64), 0, l_in - 2)
    frac = (src - lo).astype(np.float32)
    m = np.zeros((l_out, l_in), dtype=np.float32)
    rows = np.arange(l_out)
    m[rows, lo] += 1.0 - frac
    m[rows, lo + 1] += frac
    return m


def _upsample_bilinear_align_corners(x_nchw: jnp.ndarray, scale: int) -> jnp.ndarray:
    n, c, h, w = x_nchw.shape
    mh = jnp.asarray(_bilinear_matrix_np(h, h * scale))   # (Hout, H)
    mw = jnp.asarray(_bilinear_matrix_np(w, w * scale))   # (Wout, W)
    x = jnp.einsum("nchw,ow->ncho", x_nchw, mw)           # up along W
    x = jnp.einsum("ncho,ph->ncpo", x, mh)                # up along H
    return x                                              # (N, C, Hout, Wout)


def _pad_to(x_nchw: jnp.ndarray, target_h: int, target_w: int) -> jnp.ndarray:
    # TODO(synk): negative padding (cropping) as PyTorch F.pad allows is not
    # supported; upsampled x1/x2 must not exceed x3's spatial size.
    dy = target_h - x_nchw.shape[2]
    dx = target_w - x_nchw.shape[3]
    return jnp.pad(
        x_nchw,
        ((0, 0), (0, 0), (dy // 2, dy - dy // 2), (dx // 2, dx - dx // 2)),
    )


# ----------------------------------------------------------------------------
# Tiling helpers (generation-aware).
# ----------------------------------------------------------------------------
def _round_up(x: int, m: int) -> int:
    return ((x + m - 1) // m) * m


def _vmem_budget_bytes() -> int:
    cap = None
    try:
        info = pltpu.get_tpu_info()
        cap = getattr(info, "vmem_capacity_bytes", None)
    except Exception:
        cap = None
    if not cap:
        cap = 64 * 1024 * 1024          # conservative: v7x per-core VMEM
    return min(int(cap * 0.65), 100 * 1024 * 1024)


def _choose_tile(hw: int, c3: int, coutp: int, budget: int, max_tile=None) -> int:
    """Largest 128-multiple tile whose double-buffered footprint fits `budget`."""
    hw128 = _round_up(hw, 128)
    # Pass-2 footprint dominates: double-buffered x3 + zsum inputs + output, f32.
    per_lane_bytes = 2 * (c3 + 2 * coutp) * 4
    t_cap = (budget - (4 << 20)) // per_lane_bytes      # 4 MiB headroom (weights, misc)
    t_cap = min(t_cap, 8192, hw128)
    if max_tile is not None:
        t_cap = min(t_cap, max_tile)
    t_cap = max(128, (t_cap // 128) * 128)
    # Prefer a tile that divides the 128-padded HW (avoids lane padding) as
    # long as it stays within 2x of the VMEM-derived cap.
    floor = max(128, (t_cap // 2 // 128) * 128)
    t = t_cap
    while t >= floor:
        if hw128 % t == 0:
            return t
        t -= 128
    return t_cap


# ----------------------------------------------------------------------------
# Pass 1: 1x1 conv (w3 @ x3_tile + zsum_tile) + per-channel sum / sum^2.
#         Outputs only the tiny partial sums per (batch, split).
# ----------------------------------------------------------------------------
def _conv_stats_kernel(x3_ref, z_ref, w3_ref, sum_out_ref, sumsq_out_ref,
                       sum_sc, sumsq_sc):
    j = pl.program_id(2)

    @pl.when(j == 0)
    def _():
        sum_sc[...] = jnp.zeros_like(sum_sc)
        sumsq_sc[...] = jnp.zeros_like(sumsq_sc)

    # Single K=C3 MXU matmul; zsum already carries the x1/x2 contributions.
    # Conv bias intentionally omitted: InstanceNorm's per-channel mean
    # subtraction cancels a per-channel constant exactly.
    y = jnp.dot(w3_ref[...], x3_ref[0],
                preferred_element_type=jnp.float32) + z_ref[0]     # (Coutp, T)

    sum_sc[...] += jnp.sum(y, axis=1, keepdims=True)               # (Coutp, 1)
    sumsq_sc[...] += jnp.sum(y * y, axis=1, keepdims=True)

    @pl.when(j == pl.num_programs(2) - 1)
    def _():
        sum_out_ref[0] = sum_sc[...]
        sumsq_out_ref[0] = sumsq_sc[...]


# ----------------------------------------------------------------------------
# Pass 2: recompute the cheap conv, apply InstanceNorm (precomputed mean /
#         inv_std) + activation, write the output exactly once.
# ----------------------------------------------------------------------------
def _conv_norm_act_kernel(x3_ref, z_ref, w3_ref, mean_ref, inv_std_ref, o_ref,
                          *, alt_leak, neg_slope):
    y = jnp.dot(w3_ref[...], x3_ref[0],
                preferred_element_type=jnp.float32) + z_ref[0]     # (Coutp, T)
    y = (y - mean_ref[0]) * inv_std_ref[0]
    if alt_leak:
        y = jnp.where(y > 0, y, neg_slope * y)
    else:
        y = jnp.maximum(y, 0.0)
    o_ref[0] = y.astype(o_ref.dtype)


# ----------------------------------------------------------------------------
# Full module forward.
# ----------------------------------------------------------------------------
@functools.partial(jax.jit, static_argnames=("alt_leak", "neg_slope", "max_tile"))
def pathology_feature_forward(x1, x2, x3, w, b, *, alt_leak=False,
                              neg_slope=0.01, max_tile=None):
    """x1, x2, x3: NCHW float32.  w: (Cout, Cin) (PyTorch conv1x1 weight
    squeezed), b: (Cout,) — the bias is accepted for interface parity but is a
    mathematical no-op ahead of affine=False InstanceNorm, so it is unused."""
    del b
    n, c3, h, wd = x3.shape
    c1, c2 = x1.shape[1], x2.shape[1]
    cout = w.shape[0]
    hw = h * wd

    # --- Channel padding: pad Cout up to a multiple of 8 via the weight rows
    # (zsum then comes out pre-padded for free; output is sliced at the end).
    coutp = _round_up(cout, 8)
    pad_rows = coutp - cout
    wf = w.astype(jnp.float32)
    w3 = jnp.pad(wf[:, :c3],            ((0, pad_rows), (0, 0)))   # (Coutp, C3)
    w1 = jnp.pad(wf[:, c3:c3 + c1],     ((0, pad_rows), (0, 0)))   # (Coutp, C1)
    w2 = jnp.pad(wf[:, c3 + c1:],       ((0, pad_rows), (0, 0)))   # (Coutp, C2)

    # --- Commute 1x1 conv with the linear upsample + zero-pad for x1 / x2:
    # conv at LOW resolution, then upsample the Cout-channel result.  The
    # 16x / 4x inflated x1_up / x2_up are never materialised in HBM.
    z1 = jnp.einsum("nchw,dc->ndhw", x1.astype(jnp.float32), w1)
    z2 = jnp.einsum("nchw,dc->ndhw", x2.astype(jnp.float32), w2)
    zsum = (_pad_to(_upsample_bilinear_align_corners(z1, 4), h, wd)
            + _pad_to(_upsample_bilinear_align_corners(z2, 2), h, wd))

    # NCHW -> (N, C, H*W): free reshape, HW on the lane axis.
    x3f = x3.astype(jnp.float32).reshape(n, c3, hw)
    zsum = zsum.reshape(n, coutp, hw)

    # --- Generation-aware tiling along HW.
    budget = _vmem_budget_bytes()
    t = _choose_tile(hw, c3, coutp, budget, max_tile)
    n_tiles = -(-hw // t)
    hwpad = n_tiles * t
    if hwpad != hw:
        # Padded pixels are exactly 0 (no bias) -> y=0 there -> sums unaffected
        # as long as inv_hw uses the true HW.
        x3f = jnp.pad(x3f, ((0, 0), (0, 0), (0, hwpad - hw)))
        zsum = jnp.pad(zsum, ((0, 0), (0, 0), (0, hwpad - hw)))

    # Split the HW-tile range into 2 parallel chunks (keeps both v7x cores
    # busy at batch 1; harmless on single-core chips).
    n_splits = 2 if (n_tiles % 2 == 0 and n_tiles >= 2) else 1
    ntps = n_tiles // n_splits

    # ---------------- Pass 1: conv + per-channel stats (partial sums) -------
    psum, psumsq = pl.pallas_call(
        _conv_stats_kernel,
        out_shape=(
            jax.ShapeDtypeStruct((n * n_splits, coutp, 1), jnp.float32),
            jax.ShapeDtypeStruct((n * n_splits, coutp, 1), jnp.float32),
        ),
        grid_spec=pltpu.PrefetchScalarGridSpec(
            num_scalar_prefetch=0,
            grid=(n, n_splits, ntps),
            in_specs=[
                pl.BlockSpec((1, c3, t), lambda i, s, j: (i, 0, s * ntps + j)),
                pl.BlockSpec((1, coutp, t), lambda i, s, j: (i, 0, s * ntps + j)),
                pl.BlockSpec((coutp, c3), lambda i, s, j: (0, 0)),
            ],
            out_specs=(
                pl.BlockSpec((1, coutp, 1), lambda i, s, j: (i * n_splits + s, 0, 0)),
                pl.BlockSpec((1, coutp, 1), lambda i, s, j: (i * n_splits + s, 0, 0)),
            ),
            scratch_shapes=[
                pltpu.VMEM((coutp, 1), jnp.float32),
                pltpu.VMEM((coutp, 1), jnp.float32),
            ],
        ),
        compiler_params=pltpu.CompilerParams(
            dimension_semantics=("parallel", "parallel", "arbitrary"),
            vmem_limit_bytes=budget,
        ),
    )(x3f, zsum, w3)

    # Tiny epilogue in JAX: combine partial sums, build mean / inv_std.
    inv_hw = 1.0 / float(hw)
    tot = jnp.sum(psum.reshape(n, n_splits, coutp, 1), axis=1)      # (N, Coutp, 1)
    totsq = jnp.sum(psumsq.reshape(n, n_splits, coutp, 1), axis=1)
    mean = tot * inv_hw
    var = jnp.maximum(totsq * inv_hw - mean * mean, 0.0)
    inv_std = lax.rsqrt(var + 1e-5)

    # ---------------- Pass 2: recompute conv, normalize, activate -----------
    kernel2 = functools.partial(_conv_norm_act_kernel,
                                alt_leak=alt_leak, neg_slope=neg_slope)
    out = pl.pallas_call(
        kernel2,
        out_shape=jax.ShapeDtypeStruct((n, coutp, hwpad), jnp.float32),
        grid_spec=pltpu.PrefetchScalarGridSpec(
            num_scalar_prefetch=0,
            grid=(n, n_tiles),
            in_specs=[
                pl.BlockSpec((1, c3, t), lambda i, j: (i, 0, j)),
                pl.BlockSpec((1, coutp, t), lambda i, j: (i, 0, j)),
                pl.BlockSpec((coutp, c3), lambda i, j: (0, 0)),
                pl.BlockSpec((1, coutp, 1), lambda i, j: (i, 0, 0)),
                pl.BlockSpec((1, coutp, 1), lambda i, j: (i, 0, 0)),
            ],
            out_specs=pl.BlockSpec((1, coutp, t), lambda i, j: (i, 0, j)),
        ),
        compiler_params=pltpu.CompilerParams(
            dimension_semantics=("parallel", "parallel"),
            vmem_limit_bytes=budget,
        ),
    )(x3f, zsum, w3, mean, inv_std)

    # Strip channel / lane padding (no-op copies elided by XLA when unpadded).
    out = out[:, :cout, :hw].reshape(n, cout, h, wd)
    return out


# Pure-JAX reference (mirrors the PyTorch module, incl. conv bias and the
# high-resolution upsample path) for correctness checking.
def _reference_forward(x1, x2, x3, w, b):
    n, _, h, wd = x3.shape
    x1u = _pad_to(_upsample_bilinear_align_corners(x1, 4), h, wd)
    x2u = _pad_to(_upsample_bilinear_align_corners(x2, 2), h, wd)
    x = jnp.concatenate([x3, x1u, x2u], axis=1)
    y = jnp.einsum("nchw,dc->ndhw", x, w) + b[None, :, None, None]
    mean = jnp.mean(y, axis=(2, 3), keepdims=True)
    var = jnp.mean((y - mean) ** 2, axis=(2, 3), keepdims=True)
    y = (y - mean) * lax.rsqrt(var + 1e-5)
    return jnp.maximum(y, 0.0)


if __name__ == "__main__":
    key = jax.random.PRNGKey(0)
    k1, k2, k3, kw, kb = jax.random.split(key, 5)

    # Small shapes: x3 at full res, x2 at 1/2, x1 at 1/4 (so up4/up2 align).
    N, C1, C2, C3 = 2, 4, 4, 4
    H = W = 16
    x1 = jax.random.normal(k1, (N, C1, H // 4, W // 4), dtype=jnp.float32)
    x2 = jax.random.normal(k2, (N, C2, H // 2, W // 2), dtype=jnp.float32)
    x3 = jax.random.normal(k3, (N, C3, H, W), dtype=jnp.float32)

    in_features = C1 + C2 + C3      # 12
    out_features = 8

    # Synthetic Conv2d(1x1) parameters in PyTorch layout (Cout, Cin) / (Cout,).
    bound = 1.0 / np.sqrt(in_features)
    w = jax.random.uniform(kw, (out_features, in_features),
                           minval=-bound, maxval=bound, dtype=jnp.float32)
    b = jax.random.uniform(kb, (out_features,),
                           minval=-bound, maxval=bound, dtype=jnp.float32)

    # max_tile=128 -> 2 HW tiles at this toy size, exercising the tiled
    # accumulation, the 2-way HW split and the two-pass InstanceNorm path.
    out = pathology_feature_forward(x1, x2, x3, w, b, max_tile=128)
    out = jax.block_until_ready(out)

    ref = jax.block_until_ready(_reference_forward(x1, x2, x3, w, b))
    np.testing.assert_allclose(np.asarray(out), np.asarray(ref),
                               rtol=1e-3, atol=1e-3)
    assert out.shape == (N, out_features, H, W)
    print("KERNEL_OK")
</pallas_src>

<mosaic_0001>
module attributes {stable_mosaic.version = 11 : i64} {
  func.func @_conv_stats_kernel(%arg0: i32, %arg1: i32, %arg2: i32, %arg3: memref<1x4x128xf32, #tpu.memory_space<vmem>>, %arg4: memref<1x8x128xf32, #tpu.memory_space<vmem>>, %arg5: memref<8x4xf32, #tpu.memory_space<vmem>>, %arg6: memref<1x8x1xf32, #tpu.memory_space<vmem>>, %arg7: memref<1x8x1xf32, #tpu.memory_space<vmem>>, %arg8: memref<8x1xf32, #tpu.memory_space<vmem>>, %arg9: memref<8x1xf32, #tpu.memory_space<vmem>>) attributes {dimension_semantics = [#tpu.dimension_semantics<parallel>, #tpu.dimension_semantics<parallel>, #tpu.dimension_semantics<arbitrary>], iteration_bounds = array<i64: 2, 2, 1>, scalar_prefetch = 0 : i64, scratch_operands = 2 : i64, tpu.core_type = #tpu.core_type<tc>, window_params = [{transform_indices = @transform_0, window_bounds = array<i64: 1, 4, 128>}, {transform_indices = @transform_1, window_bounds = array<i64: 1, 8, 128>}, {pipeline_mode = #tpu.pipeline_mode<synchronous>, transform_indices = @transform_2, window_bounds = array<i64: 8, 4>}, {transform_indices = @transform_3, window_bounds = array<i64: 1, 8, 1>}, {transform_indices = @transform_4, window_bounds = array<i64: 1, 8, 1>}]} {
    %c0_i32 = arith.constant 0 : i32
    %0 = arith.cmpi eq, %arg2, %c0_i32 : i32
    %1 = arith.extui %0 : i1 to i32
    %c0_i32_0 = arith.constant 0 : i32
    %2 = arith.cmpi ne, %1, %c0_i32_0 : i32
    scf.if %2 {
      %cst_20 = arith.constant 0.000000e+00 : f32
      %24 = vector.broadcast %cst_20 : f32 to vector<8x1xf32>
      %c0_21 = arith.constant 0 : index
      %c0_22 = arith.constant 0 : index
      %25 = vector.load %arg8[%c0_21, %c0_22] : memref<8x1xf32, #tpu.memory_space<vmem>>, vector<8x1xf32>
      tpu.vector_store %arg8[%c0_21, %c0_22], %24 {strides = array<i32>} : memref<8x1xf32, #tpu.memory_space<vmem>>, vector<8x1xf32>,
      %cst_23 = arith.constant 0.000000e+00 : f32
      %26 = vector.broadcast %cst_23 : f32 to vector<8x1xf32>
      %c0_24 = arith.constant 0 : index
      %c0_25 = arith.constant 0 : index
      %27 = vector.load %arg9[%c0_24, %c0_25] : memref<8x1xf32, #tpu.memory_space<vmem>>, vector<8x1xf32>
      tpu.vector_store %arg9[%c0_24, %c0_25], %26 {strides = array<i32>} : memref<8x1xf32, #tpu.memory_space<vmem>>, vector<8x1xf32>,
    } else {
    }
    %c0 = arith.constant 0 : index
    %c0_1 = arith.constant 0 : index
    %3 = vector.load %arg5[%c0, %c0_1] : memref<8x4xf32, #tpu.memory_space<vmem>>, vector<8x4xf32>
    %c0_2 = arith.constant 0 : index
    %c0_3 = arith.constant 0 : index
    %c0_4 = arith.constant 0 : index
    %4 = vector.load %arg3[%c0_2, %c0_3, %c0_4] : memref<1x4x128xf32, #tpu.memory_space<vmem>>, vector<1x4x128xf32>
    %5 = vector.shape_cast %4 : vector<1x4x128xf32> to vector<4x128xf32>
    %cst = arith.constant dense<0.000000e+00> : vector<8x128xf32>
    %6 = tpu.matmul %3, %5, %cst {dimension_numbers = #tpu.dot_dimension_numbers<[1], [0], [0], [1], [0, 0, 1, 1], [], []>} : vector<8x4xf32>, vector<4x128xf32>, vector<8x128xf32> -> vector<8x128xf32>
    %c0_5 = arith.constant 0 : index
    %c0_6 = arith.constant 0 : index
    %c0_7 = arith.constant 0 : index
    %7 = vector.load %arg4[%c0_5, %c0_6, %c0_7] : memref<1x8x128xf32, #tpu.memory_space<vmem>>, vector<1x8x128xf32>
    %8 = vector.shape_cast %7 : vector<1x8x128xf32> to vector<8x128xf32>
    %9 = arith.addf %6, %8 : vector<8x128xf32>
    %c0_8 = arith.constant 0 : index
    %c0_9 = arith.constant 0 : index
    %10 = vector.load %arg8[%c0_8, %c0_9] : memref<8x1xf32, #tpu.memory_space<vmem>>, vector<8x1xf32>
    %cst_10 = arith.constant dense<0.000000e+00> : vector<8xf32>
    %11 = vector.multi_reduction <add>, %9, %cst_10 [1] : vector<8x128xf32> to vector<8xf32>
    %12 = vector.shape_cast %11 : vector<8xf32> to vector<8x1xf32>
    %13 = arith.addf %10, %12 : vector<8x1xf32>
    %c0_11 = arith.constant 0 : index
    %c0_12 = arith.constant 0 : index
    %14 = vector.load %arg8[%c0_11, %c0_12] : memref<8x1xf32, #tpu.memory_space<vmem>>, vector<8x1xf32>
    tpu.vector_store %arg8[%c0_11, %c0_12], %13 {strides = array<i32>} : memref<8x1xf32, #tpu.memory_space<vmem>>, vector<8x1xf32>,
    %c0_13 = arith.constant 0 : index
    %c0_14 = arith.constant 0 : index
    %15 = vector.load %arg9[%c0_13, %c0_14] : memref<8x1xf32, #tpu.memory_space<vmem>>, vector<8x1xf32>
    %16 = arith.mulf %9, %9 : vector<8x128xf32>
    %cst_15 = arith.constant dense<0.000000e+00> : vector<8xf32>
    %17 = vector.multi_reduction <add>, %16, %cst_15 [1] : vector<8x128xf32> to vector<8xf32>
    %18 = vector.shape_cast %17 : vector<8xf32> to vector<8x1xf32>
    %19 = arith.addf %15, %18 : vector<8x1xf32>
    %c0_16 = arith.constant 0 : index
    %c0_17 = arith.constant 0 : index
    %20 = vector.load %arg9[%c0_16, %c0_17] : memref<8x1xf32, #tpu.memory_space<vmem>>, vector<8x1xf32>
    tpu.vector_store %arg9[%c0_16, %c0_17], %19 {strides = array<i32>} : memref<8x1xf32, #tpu.memory_space<vmem>>, vector<8x1xf32>,
    %c0_i32_18 = arith.constant 0 : i32
    %21 = arith.cmpi eq, %arg2, %c0_i32_18 : i32
    %22 = arith.extui %21 : i1 to i32
    %c0_i32_19 = arith.constant 0 : i32
    %23 = arith.cmpi ne, %22, %c0_i32_19 : i32
    scf.if %23 {
      %c0_20 = arith.constant 0 : index
      %c0_21 = arith.constant 0 : index
      %24 = vector.load %arg8[%c0_20, %c0_21] : memref<8x1xf32, #tpu.memory_space<vmem>>, vector<8x1xf32>
      %c0_22 = arith.constant 0 : index
      %c0_23 = arith.constant 0 : index
      %c0_24 = arith.constant 0 : index
      %25 = vector.load %arg6[%c0_22, %c0_23, %c0_24] : memref<1x8x1xf32, #tpu.memory_space<vmem>>, vector<1x8x1xf32>
      %26 = vector.shape_cast %25 : vector<1x8x1xf32> to vector<8x1xf32>
      %27 = vector.shape_cast %24 : vector<8x1xf32> to vector<1x8x1xf32>
      tpu.vector_store %arg6[%c0_22, %c0_23, %c0_24], %27 {strides = array<i32>} : memref<1x8x1xf32, #tpu.memory_space<vmem>>, vector<1x8x1xf32>,
      %c0_25 = arith.constant 0 : index
      %c0_26 = arith.constant 0 : index
      %28 = vector.load %arg9[%c0_25, %c0_26] : memref<8x1xf32, #tpu.memory_space<vmem>>, vector<8x1xf32>
      %c0_27 = arith.constant 0 : index
      %c0_28 = arith.constant 0 : index
      %c0_29 = arith.constant 0 : index
      %29 = vector.load %arg7[%c0_27, %c0_28, %c0_29] : memref<1x8x1xf32, #tpu.memory_space<vmem>>, vector<1x8x1xf32>
      %30 = vector.shape_cast %29 : vector<1x8x1xf32> to vector<8x1xf32>
      %31 = vector.shape_cast %28 : vector<8x1xf32> to vector<1x8x1xf32>
      tpu.vector_store %arg7[%c0_27, %c0_28, %c0_29], %31 {strides = array<i32>} : memref<1x8x1xf32, #tpu.memory_space<vmem>>, vector<1x8x1xf32>,
    } else {
    }
    return
  }
  func.func @transform_0(%arg0: i32, %arg1: i32, %arg2: i32) -> (i32, i32, i32) {
    %c1_i32 = arith.constant 1 : i32
    %0 = arith.muli %arg1, %c1_i32 : i32
    %1 = arith.addi %0, %arg2 : i32
    %c0_i32 = arith.constant 0 : i32
    %c0_i32_0 = arith.constant 0 : i32
    return %arg0, %c0_i32, %1 : i32, i32, i32
  }
  func.func @transform_1(%arg0: i32, %arg1: i32, %arg2: i32) -> (i32, i32, i32) {
    %c1_i32 = arith.constant 1 : i32
    %0 = arith.muli %arg1, %c1_i32 : i32
    %1 = arith.addi %0, %arg2 : i32
    %c0_i32 = arith.constant 0 : i32
    %c0_i32_0 = arith.constant 0 : i32
    return %arg0, %c0_i32, %1 : i32, i32, i32
  }
  func.func @transform_2(%arg0: i32, %arg1: i32, %arg2: i32) -> (i32, i32) {
    %c0_i32 = arith.constant 0 : i32
    %c0_i32_0 = arith.constant 0 : i32
    %c0_i32_1 = arith.constant 0 : i32
    return %c0_i32, %c0_i32_0 : i32, i32
  }
  func.func @transform_3(%arg0: i32, %arg1: i32, %arg2: i32) -> (i32, i32, i32) {
    %c2_i32 = arith.constant 2 : i32
    %0 = arith.muli %arg0, %c2_i32 : i32
    %1 = arith.addi %0, %arg1 : i32
    %c0_i32 = arith.constant 0 : i32
    %c0_i32_0 = arith.constant 0 : i32
    %c0_i32_1 = arith.constant 0 : i32
    return %1, %c0_i32, %c0_i32_0 : i32, i32, i32
  }
  func.func @transform_4(%arg0: i32, %arg1: i32, %arg2: i32) -> (i32, i32, i32) {
    %c2_i32 = arith.constant 2 : i32
    %0 = arith.muli %arg0, %c2_i32 : i32
    %1 = arith.addi %0, %arg1 : i32
    %c0_i32 = arith.constant 0 : i32
    %c0_i32_0 = arith.constant 0 : i32
    %c0_i32_1 = arith.constant 0 : i32
    return %1, %c0_i32, %c0_i32_0 : i32, i32, i32
  }
}

module attributes {stable_mosaic.version = 11 : i64} {
  func.func @_conv_norm_act_kernel(%arg0: i32, %arg1: i32, %arg2: memref<1x4x128xf32, #tpu.memory_space<vmem>>, %arg3: memref<1x8x128xf32, #tpu.memory_space<vmem>>, %arg4: memref<8x4xf32, #tpu.memory_space<vmem>>, %arg5: memref<1x8x1xf32, #tpu.memory_space<vmem>>, %arg6: memref<1x8x1xf32, #tpu.memory_space<vmem>>, %arg7: memref<1x8x128xf32, #tpu.memory_space<vmem>>) attributes {dimension_semantics = [#tpu.dimension_semantics<parallel>, #tpu.dimension_semantics<parallel>], iteration_bounds = array<i64: 2, 2>, scalar_prefetch = 0 : i64, scratch_operands = 0 : i64, tpu.core_type = #tpu.core_type<tc>, window_params = [{transform_indices = @transform_0, window_bounds = array<i64: 1, 4, 128>}, {transform_indices = @transform_1, window_bounds = array<i64: 1, 8, 128>}, {pipeline_mode = #tpu.pipeline_mode<synchronous>, transform_indices = @transform_2, window_bounds = array<i64: 8, 4>}, {transform_indices = @transform_3, window_bounds = array<i64: 1, 8, 1>}, {transform_indices = @transform_4, window_bounds = array<i64: 1, 8, 1>}, {transform_indices = @transform_5, window_bounds = array<i64: 1, 8, 128>}]} {
    %c0 = arith.constant 0 : index
    %c0_0 = arith.constant 0 : index
    %0 = vector.load %arg4[%c0, %c0_0] : memref<8x4xf32, #tpu.memory_space<vmem>>, vector<8x4xf32>
    %c0_1 = arith.constant 0 : index
    %c0_2 = arith.constant 0 : index
    %c0_3 = arith.constant 0 : index
    %1 = vector.load %arg2[%c0_1, %c0_2, %c0_3] : memref<1x4x128xf32, #tpu.memory_space<vmem>>, vector<1x4x128xf32>
    %2 = vector.shape_cast %1 : vector<1x4x128xf32> to vector<4x128xf32>
    %cst = arith.constant dense<0.000000e+00> : vector<8x128xf32>
    %3 = tpu.matmul %0, %2, %cst {dimension_numbers = #tpu.dot_dimension_numbers<[1], [0], [0], [1], [0, 0, 1, 1], [], []>} : vector<8x4xf32>, vector<4x128xf32>, vector<8x128xf32> -> vector<8x128xf32>
    %c0_4 = arith.constant 0 : index
    %c0_5 = arith.constant 0 : index
    %c0_6 = arith.constant 0 : index
    %4 = vector.load %arg3[%c0_4, %c0_5, %c0_6] : memref<1x8x128xf32, #tpu.memory_space<vmem>>, vector<1x8x128xf32>
    %5 = vector.shape_cast %4 : vector<1x8x128xf32> to vector<8x128xf32>
    %6 = arith.addf %3, %5 : vector<8x128xf32>
    %c0_7 = arith.constant 0 : index
    %c0_8 = arith.constant 0 : index
    %c0_9 = arith.constant 0 : index
    %7 = vector.load %arg5[%c0_7, %c0_8, %c0_9] : memref<1x8x1xf32, #tpu.memory_space<vmem>>, vector<1x8x1xf32>
    %8 = vector.shape_cast %7 : vector<1x8x1xf32> to vector<8x1xf32>
    %9 = vector.broadcast %8 : vector<8x1xf32> to vector<8x128xf32>
    %10 = arith.subf %6, %9 : vector<8x128xf32>
    %c0_10 = arith.constant 0 : index
    %c0_11 = arith.constant 0 : index
    %c0_12 = arith.constant 0 : index
    %11 = vector.load %arg6[%c0_10, %c0_11, %c0_12] : memref<1x8x1xf32, #tpu.memory_space<vmem>>, vector<1x8x1xf32>
    %12 = vector.shape_cast %11 : vector<1x8x1xf32> to vector<8x1xf32>
    %13 = vector.broadcast %12 : vector<8x1xf32> to vector<8x128xf32>
    %14 = arith.mulf %10, %13 : vector<8x128xf32>
    %cst_13 = arith.constant 0.000000e+00 : f32
    %15 = vector.broadcast %cst_13 : f32 to vector<8x128xf32>
    %16 = arith.maximumf %14, %15 : vector<8x128xf32>
    %c0_14 = arith.constant 0 : index
    %c0_15 = arith.constant 0 : index
    %c0_16 = arith.constant 0 : index
    %17 = vector.load %arg7[%c0_14, %c0_15, %c0_16] : memref<1x8x128xf32, #tpu.memory_space<vmem>>, vector<1x8x128xf32>
    %18 = vector.shape_cast %17 : vector<1x8x128xf32> to vector<8x128xf32>
    %19 = vector.shape_cast %16 : vector<8x128xf32> to vector<1x8x128xf32>
    tpu.vector_store %arg7[%c0_14, %c0_15, %c0_16], %19 {strides = array<i32>} : memref<1x8x128xf32, #tpu.memory_space<vmem>>, vector<1x8x128xf32>,
    return
  }
  func.func @transform_0(%arg0: i32, %arg1: i32) -> (i32, i32, i32) {
    %c0_i32 = arith.constant 0 : i32
    %c0_i32_0 = arith.constant 0 : i32
    return %arg0, %c0_i32, %arg1 : i32, i32, i32
  }
  func.func @transform_1(%arg0: i32, %arg1: i32) -> (i32, i32, i32) {
    %c0_i32 = arith.constant 0 : i32
    %c0_i32_0 = arith.constant 0 : i32
    return %arg0, %c0_i32, %arg1 : i32, i32, i32
  }
  func.func @transform_2(%arg0: i32, %arg1: i32) -> (i32, i32) {
    %c0_i32 = arith.constant 0 : i32
    %c0_i32_0 = arith.constant 0 : i32
    %c0_i32_1 = arith.constant 0 : i32
    return %c0_i32, %c0_i32_0 : i32, i32
  }
  func.func @transform_3(%arg0: i32, %arg1: i32) -> (i32, i32, i32) {
    %c0_i32 = arith.constant 0 : i32
    %c0_i32_0 = arith.constant 0 : i32
    %c0_i32_1 = arith.constant 0 : i32
    return %arg0, %c0_i32, %c0_i32_0 : i32, i32, i32
  }
  func.func @transform_4(%arg0: i32, %arg1: i32) -> (i32, i32, i32) {
    %c0_i32 = arith.constant 0 : i32
    %c0_i32_0 = arith.constant 0 : i32
    %c0_i32_1 = arith.constant 0 : i32
    return %arg0, %c0_i32, %c0_i32_0 : i32, i32, i32
  }
  func.func @transform_5(%arg0: i32, %arg1: i32) -> (i32, i32, i32) {
    %c0_i32 = arith.constant 0 : i32
    %c0_i32_0 = arith.constant 0 : i32
    return %arg0, %c0_i32, %arg1 : i32, i32, i32
  }
}

</mosaic_0001>

<bundles_post_ra>
// kernel: pathology_feature_forward.2
= control target key start
LH: loop header
LB: loop body
LE: loop exit
PB: predicated region body
PF: predicated region fallthrough
CT: control target
= control target key end

     0   :  { %s681_s15 = smov 0   ;;  %s683_s16 = smov 0   ;;  %s757_s0 = inlined_call_operand.vmem [shape: f32[2,4,256], index: 0, kind: input, shape index: {}]   ;;  %s758_s1 = inlined_call_operand.vmem [shape: f32[2,8,256], index: 1, kind: input, shape index: {}]   ;;  %s759_s2 = inlined_call_operand.vmem [shape: f32[8,4], index: 2, kind: input, shape index: {}]   ;;  %s760_s3 = inlined_call_operand.vmem [shape: f32[4,8,1], index: 3, kind: output, shape index: {0}]   ;;  %s761_s4 = inlined_call_operand.vmem [shape: f32[4,8,1], index: 4, kind: output, shape index: {1}]  }
   0x1   :  { %s685_s17 = smov 0   ;;  %s687_s18 = smov 0  }
   0x2   :  { %s689_s19 = smov 0  }
   0x3 LB: > { %s30_s20 = sadd.s32 1, %s644_s17  ;;  %s34_s21 = sadd.s32 1, %s648_s18  ;;  %s652_s19 = sphi %s689_s19, %s15_s19   ;;  %s648_s18 = sphi %s687_s18, %s765_s18   ;;  %s644_s17 = sphi %s685_s17, %s764_s17   ;;  %s640_s16 = sphi %s683_s16, %s763_s16   ;;  %s636_s15 = sphi %s681_s15, %s762_s15  }
   0x4   : > { %p32_p0 = scmp.ge.s32.totalorder %s30_s20, 2  ;;  %p552_p1 = scmp.ge.s32.totalorder %s652_s19, 1 }
   0x5   : > { %p220_p2 = scmp.lt.s32.totalorder %s652_s19, 5 }
   0x6   : > { %s767_s20 = smov (%p32_p0, %s30_s20), 0  ;;  %s769_s21 = smov (!%p32_p0, %s34_s21), %s648_s18 }
   0x7   : > { %p221_p3 = pnand %p552_p1, %p220_p2  ;;  %p36_p4 = scmp.ge.s32.totalorder %s769_s21, 2 }
   0x8   : > { %vm306_vm0 = vcmask (!%p221_p3), 7168   ;;  %p267_p5 = scmp.lt.s32.totalorder (!%p221_p3), %s640_s16, 1  ;;  %p269_p6 = scmp.lt.s32.totalorder (!%p221_p3), %s636_s15, 1  ;;  %v654_v0 = vmov (!%p221_p3), 0.0   ;;  %vm655_vm1 = vmmov (!%p221_p3), 0   ;;  %vm316_vm2 = vcmask (!%p221_p3), 1043456  }
   0x9   : > { %s771_s21 = smov (%p36_p4, %s769_s21), 0  ;;  %224 = sbr.rel (%p221_p3) target bundleno = 395 (0x18b), region = 32 }
   0xa   : > { %307 = vst.msk [vmem:[#allocation2] sm:$0xff] (!%p221_p3), %vm306_vm0, %v654_v0  ;;  %308 = vst.msk [vmem:[#allocation3] sm:$0xff] (!%p221_p3), %vm306_vm0, %v654_v0  ;;  %567 = vmatprep.subr.mxu0 (!%p221_p3), %v654_v0  ;;  %569 = vmatprep.mubr.msk.f32.mxu0 (!%p221_p3), %vm655_vm1, %v654_v0  ;;  %v309_v1 = vld [vmem:[%s759_s2] sm:$0xff] (!%p221_p3)  ;;  %vm312_vm3 = vcmask (!%p221_p3), 31744   ;;  %s557_s10 = sshll.u32 (!%p221_p3), %s640_s16, 1 }
   0xb   : > { %s287_s11 = sadd.s32 (!%p221_p3), %s636_s15, %s557_s10 }
   0xc   : > { %p288_p7 = scmp.lt.s32.totalorder (!%p221_p3), %s287_s11, 3 }
  0x10   : > { %s268_s22 = scalar_select %p267_p5, %s640_s16, 1 }
  0x11   : > { %s270_s23 = scalar_select %p269_p6, %s636_s15, 1  ;;  %v390_v8 = vld [vmem:[#allocation2] sm:$0xff]  ;;  %v396_v11 = vld [vmem:[#allocation3] sm:$0xff] }
  0x12   : > { %s553_s24 = sshll.u32 %s268_s22, 1  ;;  %s773_s11 = smov (!%p288_p7, %s287_s11), 3 }
  0x13   : > { %s272_s25 = sadd.s32 %s553_s24, %s270_s23  ;;  %s558_s12 = sshll.u32 %s773_s11, 3 }
  0x14   : > { %s554_s26 = sshll.u32 %s272_s25, 2  ;;  %s556_s6 = sshll.u32 %s272_s25, 3 }
  0x15   : > { %s274_s29 = scalar_lea.vmem %s757_s0, %s554_s26  ;;  %s284_s9 = scalar_lea.vmem %s758_s1, %s556_s6 }
  0x16   : > { %v310_v2 = vld [vmem:[%s274_s29] sm:$0xf]  ;;  %s291_s22 = scalar_lea.vmem %s760_s3, %s558_s12  ;;  %s299_s23 = scalar_lea.vmem %s761_s4, %s558_s12 }
  0x17   : > { %568 = vmatpush3.msk.msra.mxu0 %vm316_vm2, %v310_v2  ;;  %v311_v3 = vld [vmem:[%s284_s9] sm:$0xff] }
  0x18   : > { %570 = vmatmul.mubr.msk.f32.vlgmr.msra.gmra.mrb[0].mxu0 %vm312_vm3, %v309_v1 }
  0xeb   : > { %v386_v4 = vpop.f32.mrb[0].mxu0 }
  0xec   : > { %v387_v5 = vadd.f32 %v386_v4, %v311_v3  ;;  %v571_v6 = vpop.f32.mrb[1].mxu0 }
  0xee   : > { %391 = vadd.xlane.f32.xlu0 %v387_v5  ;;  %v397_v7 = vmul.f32 %v387_v5, %v387_v5 }
  0xf2   : > { %398 = vadd.xlane.f32.xlu0 %v397_v7 }
 0x17b   : > { %v392_v9 = vpop.xlane.xlu0 %391 }
 0x17c   : > { %v393_v10 = vadd.f32 %v392_v9, %v390_v8 }
 0x17e   : > { %395 = vst.msk [vmem:[#allocation2] sm:$0xff] %vm306_vm0, %v393_v10 }
 0x17f   : > { %v399_v12 = vpop.xlane.xlu0 %398 }
 0x180   : > { %v400_v13 = vadd.f32 %v399_v12, %v396_v11 }
 0x182   : > { %401 = vst.msk [vmem:[#allocation3] sm:$0xff] %vm306_vm0, %v400_v13 }
 0x185   : > { %v405_v14 = vld [vmem:[#allocation2] sm:$0xff] }
 0x186   : > { %406 = vst.msk [vmem:[%s291_s22] sm:$0xff] %vm306_vm0, %v405_v14 }
 0x189   : > { %v407_v15 = vld [vmem:[#allocation3] sm:$0xff] }
 0x18a   : > { %408 = vst.msk [vmem:[%s299_s23] sm:$0xff] %vm306_vm0, %v407_v15 }
 0x18b PF: > { %s15_s19 = sadd.s32 1, %s652_s19   ;;  %s762_s15 = smov %s644_s17 }
 0x18c   : > { %p12_p8 = scmp.ge.s32.totalorder %s15_s19, 6   ;;  %s763_s16 = smov %s648_s18 }
 0x18d   : > { %s764_s17 = smov %s767_s20  ;;  %s765_s18 = smov %s771_s21 }
 0x18e   :  { %14 = sbr.rel (!%p12_p8) target bundleno = 3 (0x3), region = 85 }

// kernel: pathology_feature_forward.3
= control target key start
LH: loop header
LB: loop body
LE: loop exit
PB: predicated region body
PF: predicated region fallthrough
CT: control target
= control target key end

     0   :  { %s687_s18 = smov 0   ;;  %s689_s19 = smov 0   ;;  %s750_s0 = inlined_call_operand.vmem [shape: f32[2,4,256], index: 0, kind: input, shape index: {}]   ;;  %s751_s1 = inlined_call_operand.vmem [shape: f32[2,8,256], index: 1, kind: input, shape index: {}]   ;;  %s752_s2 = inlined_call_operand.vmem [shape: f32[8,4], index: 2, kind: input, shape index: {}]   ;;  %s753_s3 = inlined_call_operand.vmem [shape: f32[2,8,1], index: 3, kind: input, shape index: {}]   ;;  %s754_s4 = inlined_call_operand.vmem [shape: f32[2,8,1], index: 4, kind: input, shape index: {}]   ;;  %s755_s5 = inlined_call_operand.vmem [shape: f32[2,8,256], index: 5, kind: output, shape index: {}]  }
   0x1   :  { %s691_s20 = smov 0   ;;  %s693_s21 = smov 0  }
   0x2   :  { %s695_s22 = smov 0  }
   0x3 LB: > { %s24_s23 = sadd.s32 1, %s644_s20  ;;  %s27_s24 = sadd.s32 1, %s648_s21  ;;  %s652_s22 = sphi %s695_s22, %s15_s22   ;;  %s648_s21 = sphi %s693_s21, %s759_s21   ;;  %s644_s20 = sphi %s691_s20, %s758_s20   ;;  %s640_s19 = sphi %s689_s19, %s757_s19   ;;  %s636_s18 = sphi %s687_s18, %s756_s18  }
   0x4   : > { %p25_p0 = scmp.ge.s32.totalorder %s24_s23, 2  ;;  %p550_p1 = scmp.ge.s32.totalorder %s652_s22, 1 }
   0x5   : > { %p239_p2 = scmp.lt.s32.totalorder %s652_s22, 5 }
   0x6   : > { %s761_s23 = smov (%p25_p0, %s24_s23), 0  ;;  %s763_s24 = smov (!%p25_p0, %s27_s24), %s648_s21 }
   0x7   : > { %p240_p3 = pnand %p550_p1, %p239_p2  ;;  %p29_p4 = scmp.ge.s32.totalorder %s763_s24, 2 }
   0x8   : > { %p289_p5 = scmp.lt.s32.totalorder (!%p240_p3), %s640_s19, 1  ;;  %p291_p6 = scmp.lt.s32.totalorder (!%p240_p3), %s636_s18, 1  ;;  %v654_v0 = vmov (!%p240_p3), 0.0   ;;  %vm655_vm0 = vmmov (!%p240_p3), 0   ;;  %v656_v1 = vmov (!%p240_p3), 0   ;;  %vm328_vm1 = vcmask (!%p240_p3), 1043456  }
   0x9   : > { %s765_s24 = smov (%p29_p4, %s763_s24), 0  ;;  %243 = sbr.rel (%p240_p3) target bundleno = 244 (0xf4), region = 40 }
   0xa   : > { %565 = vmatprep.subr.mxu0 (!%p240_p3), %v654_v0  ;;  %567 = vmatprep.mubr.msk.f32.mxu0 (!%p240_p3), %vm655_vm0, %v654_v0  ;;  %v321_v3 = vld [vmem:[%s752_s2] sm:$0xff] (!%p240_p3)  ;;  %vm324_vm2 = vcmask (!%p240_p3), 31744  }
   0xb   : > { %613 = vset.pattern.permute.xlu0 (!%p240_p3), %v656_v1 }
  0x10   : > { %s767_s19 = smov (!%p289_p5, %s640_s19), 1  ;;  %s769_s18 = smov (!%p291_p6, %s636_s18), 1 }
  0x11   : > { %s551_s25 = sshll.u32 %s767_s19, 1  ;;  %s555_s26 = sshll.u32 %s767_s19, 3 }
  0x12   : > { %s294_s27 = sadd.s32 %s551_s25, %s769_s18  ;;  %s308_s30 = scalar_lea.vmem %s753_s3, %s555_s26 }
  0x13   : > { %s552_s6 = sshll.u32 %s294_s27, 2  ;;  %v402_v2 = vld [vmem:[%s308_s30] sm:$0xff]  ;;  %s312_s9 = scalar_lea.vmem %s754_s4, %s555_s26 }
  0x14   : > { %s296_s12 = scalar_lea.vmem %s750_s0, %s552_s6  ;;  %405 = vperm.xlu0 %613, %v402_v2   ;;  %v409_v5 = vld [vmem:[%s312_s9] sm:$0xff]  ;;  %s554_s15 = sshll.u32 %s294_s27, 3 }
  0x15   : > { %v322_v4 = vld [vmem:[%s296_s12] sm:$0xf]  ;;  %s304_s18 = scalar_lea.vmem %s751_s1, %s554_s15  ;;  %s320_s26 = scalar_lea.vmem %s755_s5, %s554_s15 }
  0x16   : > { %566 = vmatpush3.msk.msra.mxu0 %vm328_vm1, %v322_v4  ;;  %v323_v7 = vld [vmem:[%s304_s18] sm:$0xff] }
  0x17   : > { %568 = vmatmul.mubr.msk.f32.vlgmr.msra.gmra.mrb[0].mxu0 %vm324_vm2, %v321_v3 }
  0x18   : > { %412 = vperm.xlu0 %613, %v409_v5  }
  0x93   : > { %v406_v6 = vpop.permute.xlu0 %405 }
  0x97   : > { %v413_v12 = vpop.permute.xlu0 %412 }
  0xea   : > { %v398_v8 = vpop.f32.mrb[0].mxu0 }
  0xeb   : > { %v399_v9 = vadd.f32 %v398_v8, %v323_v7  ;;  %v569_v10 = vpop.f32.mrb[1].mxu0 }
  0xed   : > { %v408_v11 = vsub.f32 %v399_v9, %v406_v6 }
  0xef   : > { %v415_v13 = vmul.f32 %v413_v12, %v408_v11 }
  0xf1   : > { %v416_v14 = vmax.f32 %v415_v13, 0.0 }
  0xf3   : > { %417 = vst [vmem:[%s320_s26] sm:$0xff] %v416_v14 }
  0xf4 PF: > { %s15_s22 = sadd.s32 1, %s652_s22   ;;  %s756_s18 = smov %s644_s20 }
  0xf5   : > { %p12_p7 = scmp.ge.s32.totalorder %s15_s22, 6   ;;  %s757_s19 = smov %s648_s21 }
  0xf6   : > { %s758_s20 = smov %s761_s23  ;;  %s759_s21 = smov %s765_s24 }
  0xf7   :  { %14 = sbr.rel (!%p12_p7) target bundleno = 3 (0x3), region = 79 }

</bundles_post_ra>
